<compile_context>
chip_gen: v7x
topology: tpu7x:2x2x1
jax: 0.10.0
libtpu: 0.0.40
codegen_flags: <defaults>
</compile_context>

<pallas_src>
import functools

import jax
import jax.numpy as jnp
from jax.experimental import pallas as pl
from jax.experimental.pallas import tpu as pltpu


def _round_up(v, m):
    return ((v + m - 1) // m) * m


def _patch_embed_kernel(p_ref, w_ref, b_ref, o_ref):
    # p_ref: (tm, K_pad)    flattened-patch tile (compute dtype)
    # w_ref: (K_pad, N_pad) projection weight    (compute dtype, VMEM-resident)
    # b_ref: (1, N_pad)     bias (f32)
    # o_ref: (tm, N_pad)    output tile
    acc = jnp.dot(p_ref[...], w_ref[...], preferred_element_type=jnp.float32)
    o_ref[...] = (acc + b_ref[...]).astype(o_ref.dtype)


def patch_embed_forward(x, weight, bias, kernel_size, stride, padding,
                        *, compute_dtype=None, out_dtype=None):
    """
    x:      (B, C, H, W)            -- NCHW, like PyTorch
    weight: (embed_dim, C, kh, kw)  -- PyTorch Conv2d weight layout
    bias:   (embed_dim,)
    returns (B, H_out, W_out, embed_dim)  -- like x.permute(0, 2, 3, 1)
    """
    kh, kw = kernel_size
    sh, sw = stride
    ph, pw = padding
    assert (kh, kw) == (sh, sw), "PatchEmbed uses kernel_size == stride"

    B, C, H, W = x.shape
    E = weight.shape[0]

    compute_dtype = jnp.dtype(compute_dtype or x.dtype)
    out_dtype = jnp.dtype(out_dtype or compute_dtype)

    if ph or pw:
        x = jnp.pad(x, ((0, 0), (0, 0), (ph, ph), (pw, pw)))
        H, W = H + 2 * ph, W + 2 * pw

    Ho, Wo = H // kh, W // kw

    # im2col: (B, C, Ho, kh, Wo, kw) -> (B, Ho, Wo, C, kh, kw) -> (M, K).
    # Flatten order (C, kh, kw) matches the PyTorch conv weight flattening.
    # Cast to the (narrower) compute dtype first so the materialized patch
    # array costs half the HBM traffic when bf16 is used.
    # TODO(synk): for an NHWC input pipeline, fuse patch extraction into the
    # kernel (grid over (B, Ho), x BlockSpec (1, kh, W, C)) to skip this copy.
    xc = x.astype(compute_dtype)
    patches = xc.reshape(B, C, Ho, kh, Wo, kw)
    patches = jnp.transpose(patches, (0, 2, 4, 1, 3, 5))
    patches = patches.reshape(B * Ho * Wo, C * kh * kw)              # (M, K)

    w_mat = weight.reshape(E, C * kh * kw).T.astype(compute_dtype)   # (K, N)
    b_mat = bias.reshape(1, E).astype(jnp.float32)                   # (1, N)

    M, K = patches.shape
    N = E

    # Lane-dense padding: K and N up to multiples of 128.  Zero-padding K is
    # exact (contributes 0 to the dot); padded N columns are sliced off.
    K_pad = _round_up(K, 128)
    N_pad = _round_up(N, 128)

    # M tile: big enough to feed the MXU and amortize per-grid-step pipeline
    # overhead (~0.35us/step).  For SAM (M = 4096, K = N = 768 bf16) tm = 512
    # keeps the working set (2x512xK_pad in + 2x512xN_pad out + weight) well
    # under the default VMEM budget while cutting the grid to 8 steps.
    tm = 512
    if M <= tm:
        tm = _round_up(M, 8)
    M_pad = _round_up(M, tm)

    if K_pad != K:
        patches = jnp.pad(patches, ((0, 0), (0, K_pad - K)))
        w_mat = jnp.pad(w_mat, ((0, K_pad - K), (0, 0)))
    if M_pad != M:
        patches = jnp.pad(patches, ((0, M_pad - M), (0, 0)))
    if N_pad != N:
        w_mat = jnp.pad(w_mat, ((0, 0), (0, N_pad - N)))
        b_mat = jnp.pad(b_mat, ((0, 0), (0, N_pad - N)))

    bytes_accessed = (
        M_pad * K_pad * patches.dtype.itemsize
        + K_pad * N_pad * w_mat.dtype.itemsize
        + N_pad * b_mat.dtype.itemsize
        + M_pad * N_pad * jnp.dtype(out_dtype).itemsize)
    cost = pl.CostEstimate(
        flops=2 * M_pad * K_pad * N_pad,
        transcendentals=0,
        bytes_accessed=bytes_accessed)

    out = pl.pallas_call(
        _patch_embed_kernel,
        out_shape=jax.ShapeDtypeStruct((M_pad, N_pad), out_dtype),
        grid_spec=pltpu.PrefetchScalarGridSpec(
            num_scalar_prefetch=0,
            grid=(M_pad // tm,),
            in_specs=[
                pl.BlockSpec((tm, K_pad), lambda i: (i, 0)),
                # Constant block index across the grid -> weight & bias stay
                # resident in VMEM; no per-step re-DMA.
                pl.BlockSpec((K_pad, N_pad), lambda i: (0, 0)),
                pl.BlockSpec((1, N_pad), lambda i: (0, 0)),
            ],
            out_specs=pl.BlockSpec((tm, N_pad), lambda i: (i, 0)),
        ),
        compiler_params=pltpu.CompilerParams(
            dimension_semantics=("parallel",)),
        cost_estimate=cost,
    )(patches, w_mat, b_mat)

    out = out[:M, :N]
    return out.reshape(B, Ho, Wo, N)


def reference_forward(x, weight, bias, kernel_size, stride, padding):
    """Pure-JAX reference: conv NCHW + permute(0,2,3,1), all f32."""
    y = jax.lax.conv_general_dilated(
        x, weight,
        window_strides=stride,
        padding=[(padding[0], padding[0]), (padding[1], padding[1])],
        dimension_numbers=("NCHW", "OIHW", "NCHW"),
    )
    y = y + bias.reshape(1, -1, 1, 1)
    return jnp.transpose(y, (0, 2, 3, 1))


if __name__ == "__main__":
    # Small, forward-consistent shapes: B=2, C=4, H=W=16, patch 4x4, embed_dim=32.
    B, C, H, W = 2, 4, 16, 16
    kernel_size = (4, 4)
    stride = (4, 4)
    padding = (0, 0)
    embed_dim = 32

    key = jax.random.PRNGKey(0)
    kx, kw_, kb = jax.random.split(key, 3)

    x = jax.random.normal(kx, (B, C, H, W), dtype=jnp.float32)
    weight = jax.random.normal(
        kw_, (embed_dim, C, kernel_size[0], kernel_size[1]),
        dtype=jnp.float32) * 0.05
    bias = jax.random.normal(kb, (embed_dim,), dtype=jnp.float32) * 0.05

    ref = reference_forward(x, weight, bias, kernel_size, stride, padding)

    # f32 path: tight tolerance against the conv reference.
    fwd_f32 = jax.jit(functools.partial(
        patch_embed_forward, kernel_size=kernel_size, stride=stride,
        padding=padding, compute_dtype=jnp.float32, out_dtype=jnp.float32))
    out_f32 = jax.block_until_ready(fwd_f32(x, weight, bias))
    assert out_f32.shape == (B, H // stride[0], W // stride[1], embed_dim), out_f32.shape
    assert jnp.allclose(out_f32, ref, atol=1e-4, rtol=1e-4), float(
        jnp.max(jnp.abs(out_f32 - ref)))

    # bf16 operands + f32 accumulation: what real SAM shapes would run.
    fwd_bf16 = jax.jit(functools.partial(
        patch_embed_forward, kernel_size=kernel_size, stride=stride,
        padding=padding, compute_dtype=jnp.bfloat16, out_dtype=jnp.bfloat16))
    out_bf16 = jax.block_until_ready(fwd_bf16(x, weight, bias))
    assert out_bf16.shape == (B, H // stride[0], W // stride[1], embed_dim), out_bf16.shape
    err = float(jnp.max(jnp.abs(out_bf16.astype(jnp.float32) - ref)))
    assert err < 3e-2, err

    print("KERNEL_OK")
</pallas_src>

<mosaic_0001>
module attributes {stable_mosaic.version = 11 : i64} {
  func.func @_patch_embed_kernel(%arg0: i32, %arg1: memref<32x128xf32, #tpu.memory_space<vmem>>, %arg2: memref<128x128xf32, #tpu.memory_space<vmem>>, %arg3: memref<1x128xf32, #tpu.memory_space<vmem>>, %arg4: memref<32x128xf32, #tpu.memory_space<vmem>>) attributes {dimension_semantics = [#tpu.dimension_semantics<parallel>], iteration_bounds = array<i64: 1>, scalar_prefetch = 0 : i64, scratch_operands = 0 : i64, tpu.core_type = #tpu.core_type<tc>, window_params = [{transform_indices = @transform_0, window_bounds = array<i64: 32, 128>}, {pipeline_mode = #tpu.pipeline_mode<synchronous>, transform_indices = @transform_1, window_bounds = array<i64: 128, 128>}, {pipeline_mode = #tpu.pipeline_mode<synchronous>, transform_indices = @transform_2, window_bounds = array<i64: 1, 128>}, {transform_indices = @transform_3, window_bounds = array<i64: 32, 128>}]} {
    %c0 = arith.constant 0 : index
    %c0_0 = arith.constant 0 : index
    %0 = vector.load %arg1[%c0, %c0_0] : memref<32x128xf32, #tpu.memory_space<vmem>>, vector<32x128xf32>
    %c0_1 = arith.constant 0 : index
    %c0_2 = arith.constant 0 : index
    %1 = vector.load %arg2[%c0_1, %c0_2] : memref<128x128xf32, #tpu.memory_space<vmem>>, vector<128x128xf32>
    %cst = arith.constant dense<0.000000e+00> : vector<32x128xf32>
    %2 = tpu.matmul %0, %1, %cst {dimension_numbers = #tpu.dot_dimension_numbers<[1], [0], [0], [1], [0, 0, 1, 1], [], []>} : vector<32x128xf32>, vector<128x128xf32>, vector<32x128xf32> -> vector<32x128xf32>
    %c0_3 = arith.constant 0 : index
    %c0_4 = arith.constant 0 : index
    %3 = vector.load %arg3[%c0_3, %c0_4] : memref<1x128xf32, #tpu.memory_space<vmem>>, vector<1x128xf32>
    %4 = vector.broadcast %3 : vector<1x128xf32> to vector<32x128xf32>
    %5 = arith.addf %2, %4 : vector<32x128xf32>
    %c0_5 = arith.constant 0 : index
    %c0_6 = arith.constant 0 : index
    %6 = vector.load %arg4[%c0_5, %c0_6] : memref<32x128xf32, #tpu.memory_space<vmem>>, vector<32x128xf32>
    tpu.vector_store %arg4[%c0_5, %c0_6], %5 {strides = array<i32>} : memref<32x128xf32, #tpu.memory_space<vmem>>, vector<32x128xf32>,
    return
  }
  func.func @transform_0(%arg0: i32) -> (i32, i32) {
    %c0_i32 = arith.constant 0 : i32
    %c0_i32_0 = arith.constant 0 : i32
    return %arg0, %c0_i32 : i32, i32
  }
  func.func @transform_1(%arg0: i32) -> (i32, i32) {
    %c0_i32 = arith.constant 0 : i32
    %c0_i32_0 = arith.constant 0 : i32
    %c0_i32_1 = arith.constant 0 : i32
    return %c0_i32, %c0_i32_0 : i32, i32
  }
  func.func @transform_2(%arg0: i32) -> (i32, i32) {
    %c0_i32 = arith.constant 0 : i32
    %c0_i32_0 = arith.constant 0 : i32
    %c0_i32_1 = arith.constant 0 : i32
    return %c0_i32, %c0_i32_0 : i32, i32
  }
  func.func @transform_3(%arg0: i32) -> (i32, i32) {
    %c0_i32 = arith.constant 0 : i32
    %c0_i32_0 = arith.constant 0 : i32
    return %arg0, %c0_i32 : i32, i32
  }
}

</mosaic_0001>

<bundles_post_ra>
// kernel: patch_embed_forward.1
= control target key start
LH: loop header
LB: loop body
LE: loop exit
PB: predicated region body
PF: predicated region fallthrough
CT: control target
= control target key end

     0   :  { %s379_s0 = inlined_call_operand.vmem [shape: f32[32,128], index: 0, kind: input, shape index: {}]   ;;  %s380_s1 = inlined_call_operand.vmem [shape: f32[128,128], index: 1, kind: input, shape index: {}]   ;;  %s381_s2 = inlined_call_operand.vmem [shape: f32[1,128], index: 2, kind: input, shape index: {}]   ;;  %s382_s3 = inlined_call_operand.hbm [shape: f32[32,128], index: 3, kind: output, shape index: {}]  }
   0x1   :  { %v19_v0 = vld [vmem:[%s380_s1] sm:$0xff]  ;;  %v20_v1 = vld [vmem:[%s380_s1 + $0x8] sm:$0xff]  ;;  %v21_v2 = vld [vmem:[%s380_s1 + $0x10] sm:$0xff] }
   0x2   :  { %v206_v3 = vpack.c.bf16 %v20_v1, %v19_v0  ;;  %v22_v4 = vld [vmem:[%s380_s1 + $0x18] sm:$0xff]  ;;  %v23_v6 = vld [vmem:[%s380_s1 + $0x20] sm:$0xff]  ;;  %v24_v7 = vld [vmem:[%s380_s1 + $0x28] sm:$0xff] }
   0x3   :  { %v210_v5 = vpack.c.bf16 %v22_v4, %v21_v2  ;;  %v214_v8 = vpack.c.bf16 %v24_v7, %v23_v6  ;;  %v15_v9 = vld [vmem:[%s379_s0] sm:$0xff]  ;;  %v17_v10 = vld [vmem:[%s379_s0 + $0x10] sm:$0xff]  ;;  %v26_v12 = vld [vmem:[%s380_s1 + $0x38] sm:$0xff] }
   0x4   :  { %207 = vmatprep.subr.bf16.mxu0 %v206_v3  ;;  %238 = vmatprep.subr.bf16.mxu1 %v206_v3  ;;  %v25_v11 = vld [vmem:[%s380_s1 + $0x30] sm:$0xff] }
   0x5   :  { %209 = vmatpush3.bf16.msra.mxu0 %v206_v3  ;;  %246 = vmatpush3.bf16.msra.mxu1 %v206_v3 }
   0x6   :  { %211 = vmatprep.subr.bf16.mxu0 %v210_v5  ;;  %239 = vmatprep.subr.bf16.mxu1 %v210_v5 }
   0x7   :  { %200 = vmatprep.mubr.f32.mxu0 %v15_v9  ;;  %203 = vmatprep.mubr.f32.mxu1 %v17_v10 }
   0x8   :  { %8 = vsyncpa [#allocation3], 0  ;;  %v218_v13 = vpack.c.bf16 %v26_v12, %v25_v11  ;;  %v27_v14 = vld [vmem:[%s380_s1 + $0x40] sm:$0xff]  ;;  %v28_v15 = vld [vmem:[%s380_s1 + $0x48] sm:$0xff]  ;;  %s281_s26 = smov [#allocation2]  }
   0x9   :  { %213 = vmatpush3.bf16.msra.mxu0 %v210_v5  ;;  %247 = vmatpush3.bf16.msra.mxu1 %v210_v5  ;;  %v222_v16 = vpack.c.bf16 %v28_v15, %v27_v14  ;;  %v29_v17 = vld [vmem:[%s380_s1 + $0x50] sm:$0xff]  ;;  %v30_v18 = vld [vmem:[%s380_s1 + $0x58] sm:$0xff]  ;;  %v31_v20 = vld [vmem:[%s380_s1 + $0x60] sm:$0xff]  ;;  %s136_s27 = sshll.u32 %s281_s26, 4  ;;  %s137_s27 = int_to_ptr.vmem [resolvable:$true] %s136_s27 }
   0xa   :  { %215 = vmatprep.subr.bf16.mxu0 %v214_v8  ;;  %240 = vmatprep.subr.bf16.mxu1 %v214_v8  ;;  %v226_v19 = vpack.c.bf16 %v30_v18, %v29_v17  ;;  %v32_v21 = vld [vmem:[%s380_s1 + $0x68] sm:$0xff]  ;;  %v33_v23 = vld [vmem:[%s380_s1 + $0x70] sm:$0xff]  ;;  %v34_v24 = vld [vmem:[%s380_s1 + $0x78] sm:$0xff]  ;;  %p262_p1 = scmp.lt.s32.totalorder %s137_s27, %s137_s27 }
   0xb   :  { %v230_v22 = vpack.c.bf16 %v32_v21, %v31_v20  ;;  %v234_v25 = vpack.c.bf16 %v34_v24, %v33_v23  ;;  %v16_v26 = vld [vmem:[%s379_s0 + $0x8] sm:$0xff]  ;;  %v18_v27 = vld [vmem:[%s379_s0 + $0x18] sm:$0xff]  ;;  %v147_v28 = vld [vmem:[%s381_s2] ss:$0 sm:$0xff]  ;;  %s257_s0 = scalar_lea.vmem %s137_s27, 512 }
   0xc   :  { %p258_p0 = scmp.ne.s32.totalorder %s137_s27, %s257_s0  ;;  %p263_p2 = scmp.lt.s32.totalorder %s257_s0, %s257_s0 }
   0xd   :  { %217 = vmatpush3.bf16.msra.mxu0 %v214_v8  ;;  %248 = vmatpush3.bf16.msra.mxu1 %v214_v8 }
   0xe   :  { %219 = vmatprep.subr.bf16.mxu0 %v218_v13  ;;  %241 = vmatprep.subr.bf16.mxu1 %v218_v13  ;;  %p264_p3 = por %p263_p2, %p262_p1 }
  0x10   :  { %p265_p4 = pnand %p264_p3, %p258_p0 }
  0x11   :  { %221 = vmatpush3.bf16.msra.mxu0 %v218_v13  ;;  %249 = vmatpush3.bf16.msra.mxu1 %v218_v13 }
  0x12   :  { %223 = vmatprep.subr.bf16.mxu0 %v222_v16  ;;  %242 = vmatprep.subr.bf16.mxu1 %v222_v16 }
  0x15   :  { %225 = vmatpush3.bf16.msra.mxu0 %v222_v16  ;;  %250 = vmatpush3.bf16.msra.mxu1 %v222_v16 }
  0x16   :  { %227 = vmatprep.subr.bf16.mxu0 %v226_v19  ;;  %243 = vmatprep.subr.bf16.mxu1 %v226_v19 }
  0x19   :  { %229 = vmatpush3.bf16.msra.mxu0 %v226_v19  ;;  %251 = vmatpush3.bf16.msra.mxu1 %v226_v19 }
  0x1a   :  { %231 = vmatprep.subr.bf16.mxu0 %v230_v22  ;;  %244 = vmatprep.subr.bf16.mxu1 %v230_v22 }
  0x1d   :  { %233 = vmatpush3.bf16.msra.mxu0 %v230_v22  ;;  %252 = vmatpush3.bf16.msra.mxu1 %v230_v22 }
  0x1e   :  { %235 = vmatprep.subr.bf16.mxu0 %v234_v25  ;;  %245 = vmatprep.subr.bf16.mxu1 %v234_v25 }
  0x21   :  { %237 = vmatpush3.bf16.msra.mxu0 %v234_v25  ;;  %253 = vmatpush3.bf16.msra.mxu1 %v234_v25 }
  0x24   :  { %201 = vmatmul.mubr.f32.vlgmr.msra.gmra.mrb[0].mxu0 %v16_v26  ;;  %204 = vmatmul.mubr.f32.vlgmr.msra.gmra.mrb[0].mxu1 %v18_v27 }
  0xf7   :  { %v202_v29 = vpop.f32.mrb[0].mxu0  ;;  %v205_v30 = vpop.f32.mrb[0].mxu1 }
  0xf8   :  { %v114_v31 = vadd.f32 %v202_v29, %v147_v28  ;;  %v124_v32 = vadd.f32 %v205_v30, %v147_v28  ;;  %v108_v33 = vpop.f32.mrb[1].mxu0  ;;  %v118_v34 = vpop.f32.mrb[1].mxu1 }
  0xf9   :  { %v109_v35 = vadd.f32 %v147_v28, %v108_v33  ;;  %v119_v36 = vadd.f32 %v147_v28, %v118_v34 }
  0xfa   :  { %128 = vst [vmem:[#allocation2 + $0x8] sm:$0xff] %v114_v31  ;;  %130 = vst [vmem:[#allocation2 + $0x18] sm:$0xff] %v124_v32 }
  0xfb   :  { %127 = vst [vmem:[#allocation2] sm:$0xff] %v109_v35  ;;  %129 = vst [vmem:[#allocation2 + $0x10] sm:$0xff] %v119_v36 }
  0xfc   :  { %268 = shalt.err (!%p265_p4)
}
  0xfd   :  { %s269_s29 = scalar_lea.hbm %s382_s3, 512 }
  0xfe   :  { %p270_p5 = scmp.ne.s32.totalorder %s382_s3, %s269_s29  ;;  %p273_p6 = scmp.lt.u32.totalorder %s269_s29, %s382_s3 }
 0x100   :  { %p275_p7 = pnand %p273_p6, %p270_p5 }
 0x102   :  { %278 = shalt.err (!%p275_p7)
}
 0x103   :  { %s282_s7 = smov 128   ;;  %s283_s8 = smov 8  }
 0x104   :  { %142 = dma.vmem_to_hbm [thread:$0]  %s137_s27, 512, %s382_s3, [#allocation3], %s282_s7, %s282_s7, %s283_s8  }
 0x105   :  { %279 = dma.done.wait [#allocation3], 512  }
 0x106   :  { %280 = vsyncadd [#allocation3], 4294966784 }
 0x107   :  { %146 = vsyncpa [#allocation3], 1 }

</bundles_post_ra>
